<compile_context>
chip_gen: v5e
topology: v5e:2x2
jax: 0.10.0
libtpu: 0.0.40
codegen_flags: <defaults>
</compile_context>

<pallas_src>
import jax
import jax.numpy as jnp
from jax.experimental import pallas as pl
from jax.experimental.pallas import tpu as pltpu


def _pw_conv_vpu_kernel(x_ref, w_ref, b_ref, o_ref):
    """Small-channel 1x1 conv: lane-dense spatial axis, VPU FMAs, SMEM params.

    x_ref: VMEM (1, cin, ts)   w_ref: SMEM (cout, cin)   b_ref: SMEM (cout,)
    o_ref: VMEM (1, cout, ts)
    """
    cin = x_ref.shape[1]
    cout = o_ref.shape[1]
    x = x_ref[0].astype(jnp.float32)             # (cin, ts), lanes = spatial
    rows = []
    for o in range(cout):                        # fully unrolled: cout*cin FMAs
        acc = b_ref[o] + w_ref[o, 0] * x[0:1, :]
        for c in range(1, cin):
            acc = acc + w_ref[o, c] * x[c:c + 1, :]
        rows.append(acc)                         # (1, ts) f32
    out = jnp.concatenate(rows, axis=0)          # (cout, ts)
    o_ref[0] = out.astype(o_ref.dtype)


def _pw_conv_mxu_kernel(x_ref, w_ref, b_ref, o_ref):
    """Larger-channel fallback: lane-dense matmul on the MXU.

    x_ref: VMEM (1, cin, ts)  w_ref: VMEM (cout, cin)  b_ref: VMEM (cout, 1)
    o_ref: VMEM (1, cout, ts)
    """
    acc = jax.lax.dot_general(
        w_ref[...], x_ref[0],
        dimension_numbers=(((1,), (0,)), ((), ())),
        preferred_element_type=jnp.float32)      # (cout, ts)
    o_ref[0] = (acc + b_ref[...]).astype(o_ref.dtype)


def _choose_spatial_tile(hw, cap=2048):
    """Largest 128-multiple divisor of hw (<= cap), or hw itself (full block)."""
    if hw % 128 != 0:
        return hw                                # full-extent block is allowed
    ts = max(128, (min(hw, cap) // 128) * 128)
    while hw % ts != 0:
        ts -= 128
    return ts


def pointwise_conv1x1(x_nchw, weight, bias, *, vpu_channel_limit=8):
    """1x1 stride-1 Conv2d (PyTorch semantics) as a lane-dense Pallas kernel.

    weight: (Cout, Cin, 1, 1)  -- PyTorch conv2d layout
    bias:   (Cout,)
    x_nchw: (N, Cin, H, W)
    returns (N, Cout, H, W)
    """
    n, cin, h, w = x_nchw.shape
    cout = weight.shape[0]
    hw = h * w
    ts = _choose_spatial_tile(hw)
    grid = (n, hw // ts)

    x3d = x_nchw.reshape(n, cin, hw)             # reshape only; no transpose
    w2d = weight.reshape(cout, cin)

    x_spec = pl.BlockSpec((1, cin, ts), lambda i, j: (i, 0, j))
    o_spec = pl.BlockSpec((1, cout, ts), lambda i, j: (i, 0, j))

    use_vpu = cin <= vpu_channel_limit and cout <= vpu_channel_limit
    if use_vpu:
        kernel = _pw_conv_vpu_kernel
        w_arg, b_arg = w2d, bias
        w_spec = pl.BlockSpec(memory_space=pltpu.MemorySpace.SMEM)
        b_spec = pl.BlockSpec(memory_space=pltpu.MemorySpace.SMEM)
    else:
        kernel = _pw_conv_mxu_kernel
        w_arg, b_arg = w2d, bias.reshape(cout, 1)
        w_spec = pl.BlockSpec((cout, cin), lambda i, j: (0, 0))
        b_spec = pl.BlockSpec((cout, 1), lambda i, j: (0, 0))

    itemsize = jnp.dtype(x_nchw.dtype).itemsize
    cost = pl.CostEstimate(
        flops=2 * n * hw * cin * cout,
        transcendentals=0,
        bytes_accessed=(n * hw * cin + n * hw * cout) * itemsize
        + (cout * cin + cout) * 4,
    )

    out3d = pl.pallas_call(
        kernel,
        out_shape=jax.ShapeDtypeStruct((n, cout, hw), x_nchw.dtype),
        grid_spec=pltpu.PrefetchScalarGridSpec(
            num_scalar_prefetch=0,
            grid=grid,
            in_specs=[x_spec, w_spec, b_spec],
            out_specs=o_spec,
        ),
        compiler_params=pltpu.CompilerParams(
            dimension_semantics=("parallel", "parallel")),
        cost_estimate=cost,
    )(x3d, w_arg, b_arg)

    return out3d.reshape(n, cout, h, w)


def init_hfe_params(key, inplanes, outplanes, dtype=jnp.float32):
    """Deterministic synthetic parameters matching HFE.__init__ shapes."""
    ks = jax.random.split(key, 6)
    return {
        # conv1: Conv2d(inplanes, outplanes, k=1)
        "conv1_w": jax.random.normal(ks[0], (outplanes, inplanes, 1, 1), dtype) * 0.1,
        "conv1_b": jax.random.normal(ks[1], (outplanes,), dtype) * 0.1,
        # group: Conv2d(inplanes, outplanes, k=1, groups=4)
        "group_w": jax.random.normal(ks[2], (outplanes, inplanes // 4, 1, 1), dtype) * 0.1,
        "group_b": jax.random.normal(ks[3], (outplanes,), dtype) * 0.1,
        # conv2: Conv2d(inplanes, outplanes, k=1)
        "conv2_w": jax.random.normal(ks[4], (outplanes, inplanes, 1, 1), dtype) * 0.1,
        "conv2_b": jax.random.normal(ks[5], (outplanes,), dtype) * 0.1,
    }


def hfe_forward(params, x_nchw):
    # TODO(synk): conv1 and group are dead code in the reference forward
    # (their result is overwritten by conv2(x)); they are not computed here.
    return pointwise_conv1x1(x_nchw, params["conv2_w"], params["conv2_b"])


if __name__ == "__main__":
    key = jax.random.PRNGKey(0)
    kx, kp = jax.random.split(key)

    N, C, H, W = 2, 4, 16, 16          # inplanes = outplanes = 4 (groups=4 ok)
    x = jax.random.normal(kx, (N, C, H, W), jnp.float32)
    params = init_hfe_params(kp, inplanes=C, outplanes=C)

    out = hfe_forward(params, x)
    out = jax.block_until_ready(out)

    # Pure-JAX reference for the 1x1 conv (conv2(x)) to sanity-check.
    ref = jnp.einsum("nchw,oc->nohw", x, params["conv2_w"].reshape(C, C)) \
        + params["conv2_b"].reshape(1, C, 1, 1)
    assert out.shape == (N, C, H, W)
    assert jnp.allclose(out, ref, atol=1e-5, rtol=1e-5)

    print("KERNEL_OK")
</pallas_src>

<mosaic_0001>
module attributes {stable_mosaic.version = 11 : i64} {
  func.func @_pw_conv_vpu_kernel(%arg0: i32, %arg1: i32, %arg2: memref<1x4x256xf32, #tpu.memory_space<vmem>>, %arg3: memref<4x4xf32, #tpu.memory_space<smem>>, %arg4: memref<4xf32, #tpu.memory_space<smem>>, %arg5: memref<1x4x256xf32, #tpu.memory_space<vmem>>) attributes {dimension_semantics = [#tpu.dimension_semantics<parallel>, #tpu.dimension_semantics<parallel>], iteration_bounds = array<i64: 2, 1>, scalar_prefetch = 0 : i64, scratch_operands = 0 : i64, tpu.core_type = #tpu.core_type<tc>, window_params = [{transform_indices = @transform_0, window_bounds = array<i64: 1, 4, 256>}, {transform_indices = @transform_1, window_bounds = array<i64: 4, 4>}, {transform_indices = @transform_2, window_bounds = array<i64: 4>}, {transform_indices = @transform_3, window_bounds = array<i64: 1, 4, 256>}]} {
    %c0 = arith.constant 0 : index
    %c0_0 = arith.constant 0 : index
    %c0_1 = arith.constant 0 : index
    %0 = vector.load %arg2[%c0, %c0_0, %c0_1] : memref<1x4x256xf32, #tpu.memory_space<vmem>>, vector<1x4x256xf32>
    %1 = vector.shape_cast %0 : vector<1x4x256xf32> to vector<4x256xf32>
    %c0_2 = arith.constant 0 : index
    %2 = memref.load %arg4[%c0_2] : memref<4xf32, #tpu.memory_space<smem>>
    %c0_3 = arith.constant 0 : index
    %c0_4 = arith.constant 0 : index
    %3 = memref.load %arg3[%c0_3, %c0_4] : memref<4x4xf32, #tpu.memory_space<smem>>
    %4 = vector.extract_strided_slice %1 {offsets = [0, 0], sizes = [1, 256], strides = [1, 1]} : vector<4x256xf32> to vector<1x256xf32>
    %5 = vector.broadcast %3 : f32 to vector<1x256xf32>
    %6 = arith.mulf %5, %4 : vector<1x256xf32>
    %7 = vector.broadcast %2 : f32 to vector<1x256xf32>
    %8 = arith.addf %7, %6 : vector<1x256xf32>
    %c0_5 = arith.constant 0 : index
    %c1 = arith.constant 1 : index
    %9 = memref.load %arg3[%c0_5, %c1] : memref<4x4xf32, #tpu.memory_space<smem>>
    %10 = vector.extract_strided_slice %1 {offsets = [1, 0], sizes = [1, 256], strides = [1, 1]} : vector<4x256xf32> to vector<1x256xf32>
    %11 = vector.broadcast %9 : f32 to vector<1x256xf32>
    %12 = arith.mulf %11, %10 : vector<1x256xf32>
    %13 = arith.addf %8, %12 : vector<1x256xf32>
    %c0_6 = arith.constant 0 : index
    %c2 = arith.constant 2 : index
    %14 = memref.load %arg3[%c0_6, %c2] : memref<4x4xf32, #tpu.memory_space<smem>>
    %15 = vector.extract_strided_slice %1 {offsets = [2, 0], sizes = [1, 256], strides = [1, 1]} : vector<4x256xf32> to vector<1x256xf32>
    %16 = vector.broadcast %14 : f32 to vector<1x256xf32>
    %17 = arith.mulf %16, %15 : vector<1x256xf32>
    %18 = arith.addf %13, %17 : vector<1x256xf32>
    %c0_7 = arith.constant 0 : index
    %c3 = arith.constant 3 : index
    %19 = memref.load %arg3[%c0_7, %c3] : memref<4x4xf32, #tpu.memory_space<smem>>
    %20 = vector.extract_strided_slice %1 {offsets = [3, 0], sizes = [1, 256], strides = [1, 1]} : vector<4x256xf32> to vector<1x256xf32>
    %21 = vector.broadcast %19 : f32 to vector<1x256xf32>
    %22 = arith.mulf %21, %20 : vector<1x256xf32>
    %23 = arith.addf %18, %22 : vector<1x256xf32>
    %c1_8 = arith.constant 1 : index
    %24 = memref.load %arg4[%c1_8] : memref<4xf32, #tpu.memory_space<smem>>
    %c1_9 = arith.constant 1 : index
    %c0_10 = arith.constant 0 : index
    %25 = memref.load %arg3[%c1_9, %c0_10] : memref<4x4xf32, #tpu.memory_space<smem>>
    %26 = vector.extract_strided_slice %1 {offsets = [0, 0], sizes = [1, 256], strides = [1, 1]} : vector<4x256xf32> to vector<1x256xf32>
    %27 = vector.broadcast %25 : f32 to vector<1x256xf32>
    %28 = arith.mulf %27, %26 : vector<1x256xf32>
    %29 = vector.broadcast %24 : f32 to vector<1x256xf32>
    %30 = arith.addf %29, %28 : vector<1x256xf32>
    %c1_11 = arith.constant 1 : index
    %c1_12 = arith.constant 1 : index
    %31 = memref.load %arg3[%c1_11, %c1_12] : memref<4x4xf32, #tpu.memory_space<smem>>
    %32 = vector.extract_strided_slice %1 {offsets = [1, 0], sizes = [1, 256], strides = [1, 1]} : vector<4x256xf32> to vector<1x256xf32>
    %33 = vector.broadcast %31 : f32 to vector<1x256xf32>
    %34 = arith.mulf %33, %32 : vector<1x256xf32>
    %35 = arith.addf %30, %34 : vector<1x256xf32>
    %c1_13 = arith.constant 1 : index
    %c2_14 = arith.constant 2 : index
    %36 = memref.load %arg3[%c1_13, %c2_14] : memref<4x4xf32, #tpu.memory_space<smem>>
    %37 = vector.extract_strided_slice %1 {offsets = [2, 0], sizes = [1, 256], strides = [1, 1]} : vector<4x256xf32> to vector<1x256xf32>
    %38 = vector.broadcast %36 : f32 to vector<1x256xf32>
    %39 = arith.mulf %38, %37 : vector<1x256xf32>
    %40 = arith.addf %35, %39 : vector<1x256xf32>
    %c1_15 = arith.constant 1 : index
    %c3_16 = arith.constant 3 : index
    %41 = memref.load %arg3[%c1_15, %c3_16] : memref<4x4xf32, #tpu.memory_space<smem>>
    %42 = vector.extract_strided_slice %1 {offsets = [3, 0], sizes = [1, 256], strides = [1, 1]} : vector<4x256xf32> to vector<1x256xf32>
    %43 = vector.broadcast %41 : f32 to vector<1x256xf32>
    %44 = arith.mulf %43, %42 : vector<1x256xf32>
    %45 = arith.addf %40, %44 : vector<1x256xf32>
    %c2_17 = arith.constant 2 : index
    %46 = memref.load %arg4[%c2_17] : memref<4xf32, #tpu.memory_space<smem>>
    %c2_18 = arith.constant 2 : index
    %c0_19 = arith.constant 0 : index
    %47 = memref.load %arg3[%c2_18, %c0_19] : memref<4x4xf32, #tpu.memory_space<smem>>
    %48 = vector.extract_strided_slice %1 {offsets = [0, 0], sizes = [1, 256], strides = [1, 1]} : vector<4x256xf32> to vector<1x256xf32>
    %49 = vector.broadcast %47 : f32 to vector<1x256xf32>
    %50 = arith.mulf %49, %48 : vector<1x256xf32>
    %51 = vector.broadcast %46 : f32 to vector<1x256xf32>
    %52 = arith.addf %51, %50 : vector<1x256xf32>
    %c2_20 = arith.constant 2 : index
    %c1_21 = arith.constant 1 : index
    %53 = memref.load %arg3[%c2_20, %c1_21] : memref<4x4xf32, #tpu.memory_space<smem>>
    %54 = vector.extract_strided_slice %1 {offsets = [1, 0], sizes = [1, 256], strides = [1, 1]} : vector<4x256xf32> to vector<1x256xf32>
    %55 = vector.broadcast %53 : f32 to vector<1x256xf32>
    %56 = arith.mulf %55, %54 : vector<1x256xf32>
    %57 = arith.addf %52, %56 : vector<1x256xf32>
    %c2_22 = arith.constant 2 : index
    %c2_23 = arith.constant 2 : index
    %58 = memref.load %arg3[%c2_22, %c2_23] : memref<4x4xf32, #tpu.memory_space<smem>>
    %59 = vector.extract_strided_slice %1 {offsets = [2, 0], sizes = [1, 256], strides = [1, 1]} : vector<4x256xf32> to vector<1x256xf32>
    %60 = vector.broadcast %58 : f32 to vector<1x256xf32>
    %61 = arith.mulf %60, %59 : vector<1x256xf32>
    %62 = arith.addf %57, %61 : vector<1x256xf32>
    %c2_24 = arith.constant 2 : index
    %c3_25 = arith.constant 3 : index
    %63 = memref.load %arg3[%c2_24, %c3_25] : memref<4x4xf32, #tpu.memory_space<smem>>
    %64 = vector.extract_strided_slice %1 {offsets = [3, 0], sizes = [1, 256], strides = [1, 1]} : vector<4x256xf32> to vector<1x256xf32>
    %65 = vector.broadcast %63 : f32 to vector<1x256xf32>
    %66 = arith.mulf %65, %64 : vector<1x256xf32>
    %67 = arith.addf %62, %66 : vector<1x256xf32>
    %c3_26 = arith.constant 3 : index
    %68 = memref.load %arg4[%c3_26] : memref<4xf32, #tpu.memory_space<smem>>
    %c3_27 = arith.constant 3 : index
    %c0_28 = arith.constant 0 : index
    %69 = memref.load %arg3[%c3_27, %c0_28] : memref<4x4xf32, #tpu.memory_space<smem>>
    %70 = vector.extract_strided_slice %1 {offsets = [0, 0], sizes = [1, 256], strides = [1, 1]} : vector<4x256xf32> to vector<1x256xf32>
    %71 = vector.broadcast %69 : f32 to vector<1x256xf32>
    %72 = arith.mulf %71, %70 : vector<1x256xf32>
    %73 = vector.broadcast %68 : f32 to vector<1x256xf32>
    %74 = arith.addf %73, %72 : vector<1x256xf32>
    %c3_29 = arith.constant 3 : index
    %c1_30 = arith.constant 1 : index
    %75 = memref.load %arg3[%c3_29, %c1_30] : memref<4x4xf32, #tpu.memory_space<smem>>
    %76 = vector.extract_strided_slice %1 {offsets = [1, 0], sizes = [1, 256], strides = [1, 1]} : vector<4x256xf32> to vector<1x256xf32>
    %77 = vector.broadcast %75 : f32 to vector<1x256xf32>
    %78 = arith.mulf %77, %76 : vector<1x256xf32>
    %79 = arith.addf %74, %78 : vector<1x256xf32>
    %c3_31 = arith.constant 3 : index
    %c2_32 = arith.constant 2 : index
    %80 = memref.load %arg3[%c3_31, %c2_32] : memref<4x4xf32, #tpu.memory_space<smem>>
    %81 = vector.extract_strided_slice %1 {offsets = [2, 0], sizes = [1, 256], strides = [1, 1]} : vector<4x256xf32> to vector<1x256xf32>
    %82 = vector.broadcast %80 : f32 to vector<1x256xf32>
    %83 = arith.mulf %82, %81 : vector<1x256xf32>
    %84 = arith.addf %79, %83 : vector<1x256xf32>
    %c3_33 = arith.constant 3 : index
    %c3_34 = arith.constant 3 : index
    %85 = memref.load %arg3[%c3_33, %c3_34] : memref<4x4xf32, #tpu.memory_space<smem>>
    %86 = vector.extract_strided_slice %1 {offsets = [3, 0], sizes = [1, 256], strides = [1, 1]} : vector<4x256xf32> to vector<1x256xf32>
    %87 = vector.broadcast %85 : f32 to vector<1x256xf32>
    %88 = arith.mulf %87, %86 : vector<1x256xf32>
    %89 = arith.addf %84, %88 : vector<1x256xf32>
    %90 = tpu.concatenate %23, %45, %67, %89 in 0 : vector<1x256xf32>, vector<1x256xf32>, vector<1x256xf32>, vector<1x256xf32> -> vector<4x256xf32>
    %c0_35 = arith.constant 0 : index
    %c0_36 = arith.constant 0 : index
    %c0_37 = arith.constant 0 : index
    %91 = vector.load %arg5[%c0_35, %c0_36, %c0_37] : memref<1x4x256xf32, #tpu.memory_space<vmem>>, vector<1x4x256xf32>
    %92 = vector.shape_cast %91 : vector<1x4x256xf32> to vector<4x256xf32>
    %93 = vector.shape_cast %90 : vector<4x256xf32> to vector<1x4x256xf32>
    tpu.vector_store %arg5[%c0_35, %c0_36, %c0_37], %93 {strides = array<i32>} : memref<1x4x256xf32, #tpu.memory_space<vmem>>, vector<1x4x256xf32>,
    return
  }
  func.func @transform_0(%arg0: i32, %arg1: i32) -> (i32, i32, i32) {
    %c0_i32 = arith.constant 0 : i32
    %c0_i32_0 = arith.constant 0 : i32
    return %arg0, %c0_i32, %arg1 : i32, i32, i32
  }
  func.func @transform_1(%arg0: i32, %arg1: i32) -> (i32, i32) {
    %c0_i32 = arith.constant 0 : i32
    %c0_i32_0 = arith.constant 0 : i32
    %c0_i32_1 = arith.constant 0 : i32
    return %c0_i32, %c0_i32_0 : i32, i32
  }
  func.func @transform_2(%arg0: i32, %arg1: i32) -> i32 {
    %c0_i32 = arith.constant 0 : i32
    %c0_i32_0 = arith.constant 0 : i32
    return %c0_i32 : i32
  }
  func.func @transform_3(%arg0: i32, %arg1: i32) -> (i32, i32, i32) {
    %c0_i32 = arith.constant 0 : i32
    %c0_i32_0 = arith.constant 0 : i32
    return %arg0, %c0_i32, %arg1 : i32, i32, i32
  }
}

</mosaic_0001>

<bundles_post_ra>
// kernel: tpu_custom_call.1
= control target key start
LH: loop header
LB: loop body
LE: loop exit
PB: predicated region body
PF: predicated region fallthrough
CT: control target
= control target key end

     0   :  { %8 = vsyncpa [#allocation3], 0  ;;  %s1005_s0 = inlined_call_operand.hbm [shape: f32[2,4,256], index: 0, kind: input, shape index: {}]   ;;  %s1006_s1 = inlined_call_operand.hbm [shape: f32[4,4], index: 1, kind: input, shape index: {}]   ;;  %s1007_s2 = inlined_call_operand.vmem [shape: f32[4], index: 2, kind: input, shape index: {}]   ;;  %s1008_s3 = inlined_call_operand.hbm [shape: f32[2,4,256], index: 3, kind: output, shape index: {}]  }
   0x1   :  { %10 = vsyncpa [#allocation3 + $0x1], 0 }
   0x2   :  { %11 = vsyncpa [#allocation5], 0 }
   0x3   :  { %12 = vsyncpa [#allocation6], 0 }
   0x4   :  { %13 = vsyncpa [#allocation4], 0 }
   0x5   :  { %15 = vsyncpa [#allocation4 + $0x1], 0  ;;  %s828_s12 = smov 0   ;;  %s830_s13 = smov 0  }
   0x6   :  { %s832_s14 = smov 0   ;;  %s834_s15 = smov 0  }
   0x7   :  { %s836_s16 = smov 0   ;;  %s838_s17 = smov 0  }
   0x8 LB: > { %s520_s18 = sadd.s32 4294967295, %s804_s17   ;;  %s521_s19 = sadd.s32 4294967294, %s804_s17   ;;  %s804_s17 = sphi %s838_s17, %s21_s17   ;;  %s800_s16 = sphi %s836_s16, %s1018_s16   ;;  %s796_s15 = sphi %s834_s15, %s1017_s15   ;;  %s792_s14 = sphi %s832_s14, %s1016_s14   ;;  %s788_s13 = sphi %s830_s13, %s1015_s13   ;;  %s784_s12 = sphi %s828_s12, %s1014_s12  }
   0x9   : > { %p55_p0 = scmp.ne.s32.totalorder %s788_s13, %s784_s12  ;;  %p862_p1 = scmp.eq.s32.totalorder %s520_s18, 0 }
   0xa   : > { %p129_p2 = scmp.eq.s32.totalorder %s521_s19, 1  ;;  %p522_p4 = scmp.ge.s32.totalorder %s804_s17, 1 }
   0xb   : > { %p868_p3 = por %p862_p1, %p55_p0  ;;  %p136_p6 = scmp.lt.s32.totalorder %s804_s17, 3 }
   0xc   : > { %p873_p5 = por %p129_p2, %p55_p0  ;;  %s148_s25 = sshll.u32 %s1006_s1, 4  ;;  %s149_s25 = int_to_ptr.hbm [resolvable:$true] %s148_s25 }
   0xd   : > { %p881_p7 = pnand %p522_p4, %p136_p6  ;;  %p525_p8 = scmp.ge.s32.totalorder %s804_s17, 2 }
   0xe   : > { %s158_s29 = sshll.u32 %s1007_s2, 4  ;;  %s806_s30 = smov [#allocation7]   ;;  %s159_s29 = int_to_ptr.vmem [resolvable:$true] %s158_s29 }
   0xf   : > { %p583_p9 = pneg %p881_p7  ;;  %s807_s4 = smov [#allocation8]  }
  0x10   : > { %p123_p11 = scmp.eq.s32.totalorder %s520_s18, 1  ;;  %s33_s5 = sadd.s32 1, %s800_s16 }
  0x11   : > { %p584_p10 = pnand %p583_p9, %p862_p1  ;;  %p35_p12 = scmp.ge.s32.totalorder %s33_s5, 2 }
  0x12   : > { %s42_s6 = sadd.s32 1, %s792_s14  ;;  %p49_p13 = scmp.ne.s32.totalorder %s792_s14, %s788_s13 }
  0x13   : > { %586 = dma.hbm_to_smem (!%p584_p10), %s149_s25, 64, %s806_s30, [#allocation5]  }
  0x14   : > { %589 = dma.vmem_to_smem (!%p584_p10), %s159_s29, 16, %s807_s4, [#allocation6]  }
  0x15   : > { %p50_p0 = scmp.eq.s32.totalorder %s804_s17, 0  ;;  %s1020_s5 = smov (%p35_p12, %s33_s5), 0 }
  0x16   : > { %p900_p2 = por %p123_p11, %p49_p13  ;;  %p600_p4 = scmp.lt.s32.totalorder %s804_s17, 2 }
  0x17   : > { %s37_s8 = ssub.s32 %s800_s16, %s1020_s5  ;;  %s169_s9 = sand.u32 1, %s792_s14  }
  0x18   : > { %p40_p6 = scmp.eq.s32.totalorder %s37_s8, 0  ;;  %p51_p9 = por %p50_p0, %p49_p13 }
  0x19   : > { %s526_s10 = sshll.u32 %s169_s9, 3  ;;  %s569_s11 = sshll.u32 %s800_s16, 3 }
  0x1a   : > { %s910_s18 = scalar_select %p40_p6, %s792_s14, %s42_s6  }
  0x1b   : > { %s180_s24 = scalar_lea.hbm %s1005_s0, %s569_s11  ;;  %s173_s27 = scalar_lea.vmem [#allocation2], %s526_s10 }
  0x1c   : > { %s182_s25 = sshll.u32 %s180_s24, 4  ;;  %s184_s28 = sshll.u32 %s173_s27, 4  ;;  %s183_s25 = int_to_ptr.hbm [resolvable:$true] %s182_s25  ;;  %s185_s28 = int_to_ptr.vmem [resolvable:$true] %s184_s28 }
  0x1d   : > { %p591_p10 = pnand %p600_p4, %p51_p9  ;;  %s170_s29 = scalar_lea.sflag [#allocation3], %s169_s9 }
  0x1e   : > { %193 = sbr.rel (%p881_p7) target bundleno = 85 (0x55), region = 32  ;;  %s920_s30 = sand.u32 (!%p881_p7), 1, %s788_s13  }
  0x1f   : > { %593 = dma.hbm_to_vmem [thread:$0]  (!%p591_p10), %s183_s25, 128, %s185_s28, %s170_s29  }
  0x20   : > { %s530_s4 = sshll.u32 (!%p881_p7), %s920_s30, 3  ;;  %s196_s6 = scalar_lea.sflag (!%p881_p7), [#allocation3], %s920_s30 }
  0x21   : > { %s199_s8 = scalar_lea.vmem (!%p881_p7), [#allocation2], %s530_s4 }
  0x23   : > { %767 = dma.done.wait (%p868_p3), %s196_s6, 128  }
  0x24   : > { %769 = vsyncadd (%p868_p3), %s196_s6, 4294967168 }
  0x25   : > { %771 = dma.done.wait (%p862_p1), [#allocation5], 64  }
  0x26   : > { %773 = vsyncadd (%p862_p1), [#allocation5], 4294967232 }
  0x27   : > { %775 = dma.done.wait (%p862_p1), [#allocation6], 16  }
  0x28   : > { %777 = vsyncadd (%p862_p1), [#allocation6], 4294967280 }
  0x29   : > { %215 = sfence }
  0x2a   : > { %s237_s26 = sld [smem:[#allocation8]]  ;;  %v938_v0 = vld [vmem:[%s199_s8] sm:$0xff]  ;;  %vm377_vm0 = vcmask 1040384   ;;  %vm380_vm1 = vcmask 1041408   ;;  %vm383_vm2 = vcmask 1042432   ;;  %vm389_vm3 = vcmask 1043456  }
  0x2b   : > { %s238_s9 = sld [smem:[#allocation7]] }
  0x2c   : > { %s534_s10 = sld [smem:[#allocation7 + $0x1]] }
  0x2d   : > { %s536_s11 = sld [smem:[#allocation7 + $0x2]] }
  0x2e   : > { %s538_s19 = sld [smem:[#allocation7 + $0x3]] }
  0x2f   : > { %s940_s21 = sld [smem:[#allocation8 + $0x1]] }
  0x30   : > { %s541_s23 = sld [smem:[#allocation7 + $0x80]]  ;;  %v241_v2 = vstv %s237_s26 }
  0x31   : > { %v239_v1 = vstv %s238_s9  ;;  %s542_s24 = sld [smem:[#allocation7 + $0x81]] }
  0x32   : > { %v240_v3 = vmul.f32 %v239_v1, %v938_v0  ;;  %v244_v4 = vstv %s534_s10  ;;  %s544_s20 = sld [smem:[#allocation7 + $0x82]] }
  0x33   : > { %v245_v5 = vmul.f32 %v244_v4, %v938_v0  ;;  %v252_v6 = vstv %s536_s11  ;;  %s546_s25 = sld [smem:[#allocation7 + $0x83]] }
  0x34   : > { %v242_v7 = vadd.f32 %v241_v2, %v240_v3  ;;  %v253_v8 = vmul.f32 %v252_v6, %v938_v0  ;;  %v260_v9 = vstv %s538_s19  ;;  %s945_s27 = sld [smem:[#allocation8 + $0x2]] }
  0x35   : > { %v535_v10 = vrot.slane %v245_v5, 9  ;;  %v261_v11 = vmul.f32 %v260_v9, %v938_v0  ;;  %s549_s28 = sld [smem:[#allocation7 + $0x100]]  ;;  %v271_v14 = vstv %s940_s21  ;;  %s570_s21 = sshll.u32 %s796_s15, 3 }
  0x36   : > { %v537_v12 = vrot.slane %v253_v8, 10  ;;  %v269_v13 = vstv %s541_s23  ;;  %s550_s29 = sld [smem:[#allocation7 + $0x101]] }
  0x37   : > { %v250_v15 = vadd.f32 %v535_v10, %v242_v7  ;;  %v270_v16 = vmul.f32 %v269_v13, %v938_v0  ;;  %v274_v17 = vstv %s542_s24  ;;  %s552_s6 = sld [smem:[#allocation7 + $0x102]]  ;;  %v539_v18 = vrot.slane %v261_v11, 11 }
  0x38   : > { %v275_v19 = vmul.f32 %v274_v17, %v938_v0  ;;  %v282_v20 = vstv %s544_s20  ;;  %s554_s8 = sld [smem:[#allocation7 + $0x103]]  ;;  %s407_s20 = scalar_lea.hbm %s1008_s3, %s570_s21 }
  0x39   : > { %v258_v21 = vadd.f32 %v537_v12, %v250_v15  ;;  %v272_v22 = vadd.f32 %v271_v14, %v270_v16  ;;  %v283_v23 = vmul.f32 %v282_v20, %v938_v0  ;;  %v290_v24 = vstv %s546_s25  ;;  %s952_s26 = sld [smem:[#allocation8 + $0x3]]  ;;  %s233_s25 = scalar_lea.vmem [#allocation9], %s530_s4 }
  0x3a   : > { %v543_v25 = vrot.slane %v275_v19, 9  ;;  %v291_v26 = vmul.f32 %v290_v24, %v938_v0  ;;  %s557_s9 = sld [smem:[#allocation7 + $0x180]]  ;;  %v301_v29 = vstv %s945_s27  ;;  %s409_s27 = sshll.u32 %s233_s25, 4  ;;  %s410_s27 = int_to_ptr.vmem [resolvable:$true] %s409_s27 }
  0x3b   : > { %v545_v27 = vrot.slane %v283_v23, 10  ;;  %v299_v28 = vstv %s549_s28  ;;  %s558_s10 = sld [smem:[#allocation7 + $0x181]]  ;;  %v266_v34 = vadd.f32 %v539_v18, %v258_v21  ;;  %s411_s15 = sshll.u32 %s407_s20, 4  ;;  %s412_s15 = int_to_ptr.hbm [resolvable:$true] %s411_s15 }
  0x3c   : > { %v280_v30 = vadd.f32 %v543_v25, %v272_v22  ;;  %v547_v31 = vrot.slane %v291_v26, 11  ;;  %v300_v32 = vmul.f32 %v299_v28, %v938_v0  ;;  %v304_v33 = vstv %s550_s29  ;;  %s560_s11 = sld [smem:[#allocation7 + $0x182]]  ;;  %s394_s28 = scalar_lea.sflag [#allocation4], %s920_s30 }
  0x3d   : > { %v305_v35 = vmul.f32 %v304_v33, %v938_v0  ;;  %v312_v36 = vstv %s552_s6  ;;  %s562_s19 = sld [smem:[#allocation7 + $0x183]]  ;;  %v358_v53 = vperm.slane %v266_v34, 0  ;;  %v359_v54 = vperm.slane %v266_v34, 4  ;;  %s728_s29 = sshra.s32 %s412_s15, 4  ;;  %s729_s29 = int_to_ptr.hbm [resolvable:$true] %s728_s29 }
  0x3e   : > { %v288_v37 = vadd.f32 %v545_v27, %v280_v30  ;;  %v302_v38 = vadd.f32 %v301_v29, %v300_v32  ;;  %v313_v39 = vmul.f32 %v312_v36, %v938_v0  ;;  %v320_v40 = vstv %s554_s8  ;;  %s730_s6 = scalar_lea.hbm %s729_s29, 8  ;;  %p735_p11 = scmp.lt.s32.totalorder %s729_s29, %s1008_s3 }
  0x3f   : > { %v551_v41 = vrot.slane %v305_v35, 9  ;;  %v321_v42 = vmul.f32 %v320_v40, %v938_v0  ;;  %v331_v46 = vstv %s952_s26  ;;  %p731_p1 = scmp.ne.s32.totalorder %s729_s29, %s730_s6  ;;  %s734_s26 = scalar_lea.hbm %s1008_s3, 16 }
  0x40   : > { %v296_v43 = vadd.f32 %v547_v31, %v288_v37  ;;  %v553_v44 = vrot.slane %v313_v39, 10  ;;  %v329_v45 = vstv %s557_s9  ;;  %p736_p12 = scmp.lt.s32.totalorder %s734_s26, %s730_s6 }
  0x41   : > { %v310_v47 = vadd.f32 %v551_v41, %v302_v38  ;;  %v555_v48 = vrot.slane %v321_v42, 11  ;;  %v330_v49 = vmul.f32 %v329_v45, %v938_v0  ;;  %v334_v50 = vstv %s558_s10  ;;  %p732_p3 = pnand %p731_p1, %p900_p2 }
  0x42   : > { %v335_v51 = vmul.f32 %v334_v50, %v938_v0  ;;  %v342_v52 = vstv %s560_s11  ;;  %v363_v61 = vperm.slane %v296_v43, 0  ;;  %v364_v62 = vperm.slane %v296_v43, 4  ;;  %p737_p13 = por %p736_p12, %p735_p11 }
  0x43   : > { %v318_v55 = vadd.f32 %v553_v44, %v310_v47  ;;  %v332_v56 = vadd.f32 %v331_v46, %v330_v49  ;;  %v343_v57 = vmul.f32 %v342_v52, %v938_v0  ;;  %v350_v58 = vstv %s562_s19  ;;  %p733_p7 = pneg %p732_p3 }
  0x44   : > { %v559_v59 = vrot.slane %v335_v51, 9  ;;  %v351_v60 = vmul.f32 %v350_v58, %v938_v0  ;;  %v378_v7 = vsel %vm377_vm0, %v358_v53, %v363_v61  ;;  %v379_v8 = vsel %vm377_vm0, %v359_v54, %v364_v62 }
  0x45   : > { %v326_v63 = vadd.f32 %v555_v48, %v318_v55  ;;  %v561_v1 = vrot.slane %v343_v57, 10  ;;  %p738_p0 = pnand %p737_p13, %p733_p7 }
  0x46   : > { %v340_v2 = vadd.f32 %v559_v59, %v332_v56  ;;  %v563_v3 = vrot.slane %v351_v60, 11 }
  0x47   : > { %v368_v4 = vperm.slane %v326_v63, 0  ;;  %v369_v5 = vperm.slane %v326_v63, 4 }
  0x48   : > { %v348_v6 = vadd.f32 %v561_v1, %v340_v2 }
  0x49   : > { %v381_v0 = vsel %vm380_vm1, %v378_v7, %v368_v4  ;;  %v382_v10 = vsel %vm380_vm1, %v379_v8, %v369_v5 }
  0x4a   : > { %v356_v9 = vadd.f32 %v563_v3, %v348_v6 }
  0x4c   : > { %v373_v11 = vperm.slane %v356_v9, 0  ;;  %v374_v12 = vperm.slane %v356_v9, 4 }
  0x4e   : > { %v384_v13 = vsel %vm383_vm2, %v381_v0, %v373_v11  ;;  %v385_v14 = vsel %vm383_vm2, %v382_v10, %v374_v12 }
  0x4f   : > { %v388_v15 = vrot.slane %v385_v14, 4 }
  0x51   : > { %v390_v16 = vsel %vm389_vm3, %v384_v13, %v388_v15 }
  0x52   : > { %392 = vst [vmem:[%s233_s25] sm:$0xff] %v390_v16 }
  0x53   : > { %741 = shalt.err (!%p738_p0)
}
  0x54   : > { %581 = dma.vmem_to_hbm [thread:$0]  (%p900_p2), %s410_s27, 128, %s412_s15, %s394_s28  }
  0x55 PF: > { %s423_s30 = sand.u32 1, %s784_s12   ;;  %p595_p4 = pnand %p525_p8, %p873_p5 }
  0x56   : > { %s424_s11 = scalar_lea.sflag [#allocation4], %s423_s30 }
  0x57   : > { %p596_p6 = pneg %p595_p4 }
  0x59   : > { %779 = dma.done.wait (%p596_p6), %s424_s11, 128  }
  0x5a   : > { %781 = vsyncadd (%p596_p6), %s424_s11, 4294967168  ;;  %s21_s17 = sadd.s32 1, %s804_s17   ;;  %s1014_s12 = smov %s788_s13 }
  0x5b   : > { %p18_p9 = scmp.ge.s32.totalorder %s21_s17, 4   ;;  %s1015_s13 = smov %s792_s14 }
  0x5c   : > { %s1016_s14 = smov %s910_s18  ;;  %s1017_s15 = smov %s800_s16 }
  0x5d   : > { %s1018_s16 = smov %s1020_s5  ;;  %20 = sbr.rel (!%p18_p9) target bundleno = 8 (0x8), region = 87 }
  0x62   :  { %430 = vsyncpa [#allocation3], 1 }
  0x63   :  { %432 = vsyncpa [#allocation3 + $0x1], 1 }
  0x64   :  { %433 = vsyncpa [#allocation4], 1 }
  0x65   :  { %435 = vsyncpa [#allocation4 + $0x1], 1 }
  0x66   :  { %436 = vsyncpa [#allocation5], 1 }
  0x67   :  { %438 = vsyncpa [#allocation5 + $0x1], 1 }
  0x68   :  { %439 = vsyncpa [#allocation6], 1 }
  0x69   :  { %441 = vsyncpa [#allocation6 + $0x1], 1 }

</bundles_post_ra>
